<compile_context>
chip_gen: v7x
topology: tpu7x:2x2x1
jax: 0.10.0
libtpu: 0.0.40
codegen_flags: <defaults>
</compile_context>

<pallas_src>
import jax
import jax.numpy as jnp
from jax.experimental import pallas as pl
from jax.experimental.pallas import tpu as pltpu

MASK_BIAS = -1e30  # finite "-inf": keeps softmax well-defined if a row is fully masked


# ----------------------------------------------------------------------------- kernel
def self_attention_kernel(x_ref, mask_ref, wf_ref, bf_ref, ko_ref,
                          applied_ref, weights_ref):
    bt, l, d = x_ref.shape
    x = x_ref[...].reshape(bt * l, d)                     # (Bt*L, D): fills the MXU M dim

    # One fused MXU matmul for all four Highway projections (bf16 in, f32 accumulate).
    # Column blocks of wf: [key_Wh | key_Wt | val_Wh | val_Wt]
    z = jnp.dot(x.astype(jnp.bfloat16), wf_ref[...],
                preferred_element_type=jnp.float32) + bf_ref[...]        # (Bt*L, 4D)

    h_k = jnp.maximum(z[:, 0 * d:1 * d], 0.0)
    t_k = jax.nn.sigmoid(z[:, 1 * d:2 * d])
    h_v = jnp.maximum(z[:, 2 * d:3 * d], 0.0)
    t_v = jax.nn.sigmoid(z[:, 3 * d:4 * d])

    # Highway blend in f32 (H*T + x*(1-T) == x + T*(H - x), one fewer VALU op).
    key_hw = (x + t_k * (h_k - x)).reshape(bt, l, d)
    values = (x + t_v * (h_v - x)).reshape(bt, l, d)

    # key -> scalar score: VPU multiply + lane reduction (avoids an N=1 MXU matmul).
    scores = jnp.sum(key_hw * ko_ref[...], axis=-1)                      # (Bt, L)

    # Masked softmax over the sequence axis (lane axis), row-major layout.
    s = scores + mask_ref[...].reshape(bt, l)
    m = jnp.max(s, axis=-1, keepdims=True)
    e = jnp.exp(s - m)
    denom = jnp.sum(e, axis=-1, keepdims=True)
    w = e * pl.reciprocal(denom, approx=True)                            # (Bt, L)
    w3 = w.reshape(bt, 1, l)

    weights_ref[...] = w3                                                # lane-dense store
    # applied = weights @ values as a small batched matmul.
    applied_ref[...] = jnp.einsum('bql,bld->bqd', w3, values,
                                  preferred_element_type=jnp.float32)    # (Bt, 1, D)


# ----------------------------------------------------------------------------- wrapper
def _pick_batch_tile(B, L, target_rows=256, max_rows=4096):
    """Smallest divisor Bt of B with Bt*L >= target_rows (fills the MXU M dim),
    capped so the activation tile stays a reasonable size."""
    divisors = [d for d in range(1, B + 1) if B % d == 0]
    ok = [d for d in divisors if d * L <= max_rows]
    for d in ok:
        if d * L >= target_rows:
            return d
    return ok[-1] if ok else 1


def _vmem_limit_bytes(Bt, L, D):
    act = Bt * L * D * 4                         # x block (f32)
    outs = Bt * D * 4 + Bt * L * 4               # applied + weights blocks
    mask = Bt * L * 4
    wts = (D * 4 * D) * 2 + 4 * D * 4 + D * 4    # fused bf16 weights + f32 biases + k_wo
    est = 2 * (act + outs + mask + wts) + 16 * act + (1 << 20)   # dbl-buffer + temporaries
    return int(min(112 * 2**20, max(32 * 2**20, 4 * est)))


def self_attention(embeddings, params, lengths=None, *, batch_tile=None):
    """embeddings: (B, L, D) f32, lengths: (B,) int32 or None.
    Returns (applied (B,1,D), weights (B,1,L)), matching the PyTorch module."""
    B, L, D = embeddings.shape
    w_fused, b_fused, k_wo_row = params

    if lengths is None:
        lengths = jnp.full((B,), L, dtype=jnp.int32)
    lengths = lengths.astype(jnp.int32)

    # Additive length-mask bias, lane-dense (B, 1, L).  -1e30 keeps length==0 rows finite.
    pos = jnp.arange(L, dtype=jnp.int32)[None, :]
    mask_bias = jnp.where(pos < lengths[:, None], 0.0, MASK_BIAS)
    mask_bias = mask_bias.astype(jnp.float32)[:, None, :]                # (B, 1, L)

    Bt = batch_tile if batch_tile is not None else _pick_batch_tile(B, L)
    assert B % Bt == 0, "batch tile must divide batch"
    grid = (B // Bt,)

    grid_spec = pltpu.PrefetchScalarGridSpec(
        num_scalar_prefetch=0,
        grid=grid,
        in_specs=[
            pl.BlockSpec((Bt, L, D), lambda b: (b, 0, 0)),    # embeddings
            pl.BlockSpec((Bt, 1, L), lambda b: (b, 0, 0)),    # additive mask bias
            pl.BlockSpec((D, 4 * D), lambda b: (0, 0)),       # fused Highway weights (bf16)
            pl.BlockSpec((1, 4 * D), lambda b: (0, 0)),       # fused Highway biases (f32)
            pl.BlockSpec((1, D),     lambda b: (0, 0)),       # key output row (f32)
        ],
        out_specs=[
            pl.BlockSpec((Bt, 1, D), lambda b: (b, 0, 0)),    # applied
            pl.BlockSpec((Bt, 1, L), lambda b: (b, 0, 0)),    # weights, lane-dense
        ],
    )

    applied, weights = pl.pallas_call(
        self_attention_kernel,
        out_shape=(
            jax.ShapeDtypeStruct((B, 1, D), jnp.float32),
            jax.ShapeDtypeStruct((B, 1, L), jnp.float32),
        ),
        grid_spec=grid_spec,
        compiler_params=pltpu.CompilerParams(
            dimension_semantics=("parallel",),
            vmem_limit_bytes=_vmem_limit_bytes(Bt, L, D)),
    )(embeddings, mask_bias, w_fused, b_fused, k_wo_row)

    return applied, weights


# ----------------------------------------------------------------------------- params / reference
def init_params(key, D):
    """Deterministic synthetic params.  The four (D,D) Highway matrices are stored
    pre-transposed and fused column-wise into one (D, 4D) bf16 matrix."""
    ks = jax.random.split(key, 5)
    s = 0.1
    k_wh = s * jax.random.normal(ks[0], (D, D), jnp.float32)
    k_wt = s * jax.random.normal(ks[1], (D, D), jnp.float32)
    v_wh = s * jax.random.normal(ks[2], (D, D), jnp.float32)
    v_wt = s * jax.random.normal(ks[3], (D, D), jnp.float32)
    k_wo = s * jax.random.normal(ks[4], (D, 1), jnp.float32)

    w_fused = jnp.concatenate([k_wh, k_wt, v_wh, v_wt], axis=1).astype(jnp.bfloat16)
    b_fused = jnp.concatenate(
        [jnp.zeros((1, D)), jnp.full((1, D), -1.0),          # key: bh=0, gate bias=-1
         jnp.zeros((1, D)), jnp.full((1, D), -1.0)],         # value: bh=0, gate bias=-1
        axis=1).astype(jnp.float32)                          # (1, 4D)
    k_wo_row = k_wo.T.astype(jnp.float32)                    # (1, D)
    return (w_fused, b_fused, k_wo_row)


def _reference(x, params, lengths):
    """Pure-JAX reference of the forward pass, with the same precision choices
    (bf16 MXU inputs, f32 accumulation) as the kernel."""
    w_fused, b_fused, k_wo_row = params
    B, L, D = x.shape
    x2 = x.reshape(B * L, D)
    z = jnp.dot(x2.astype(jnp.bfloat16), w_fused,
                preferred_element_type=jnp.float32) + b_fused
    h_k = jax.nn.relu(z[:, 0 * D:1 * D]); t_k = jax.nn.sigmoid(z[:, 1 * D:2 * D])
    h_v = jax.nn.relu(z[:, 2 * D:3 * D]); t_v = jax.nn.sigmoid(z[:, 3 * D:4 * D])
    key_hw = h_k * t_k + x2 * (1.0 - t_k)
    values = (h_v * t_v + x2 * (1.0 - t_v)).reshape(B, L, D)

    scores = jnp.sum(key_hw * k_wo_row, axis=-1).reshape(B, L)
    mask = jnp.arange(L)[None, :] < lengths[:, None]
    scores = jnp.where(mask, scores, MASK_BIAS)
    w = jax.nn.softmax(scores, axis=-1)[:, None, :]                      # (B, 1, L)
    applied = jnp.einsum('bol,bld->bod', w, values)                      # (B, 1, D)
    return applied, w


# ----------------------------------------------------------------------------- main
if __name__ == "__main__":
    B, L, D = 2, 8, 32
    key = jax.random.PRNGKey(0)
    kx, kp = jax.random.split(key)
    x = jax.random.normal(kx, (B, L, D), jnp.float32)
    lengths = jnp.array([8, 5], dtype=jnp.int32)
    params = init_params(kp, D)

    fn = jax.jit(self_attention)
    applied, weights = fn(x, params, lengths)
    applied = jax.block_until_ready(applied)
    weights = jax.block_until_ready(weights)

    applied_ref, weights_ref = _reference(x, params, lengths)

    assert applied.shape == (B, 1, D) and weights.shape == (B, 1, L)
    # Tolerance covers the EUP approximate reciprocal and accumulation-order differences.
    assert jnp.allclose(weights, weights_ref, atol=2e-3, rtol=2e-3), "weights mismatch"
    assert jnp.allclose(applied, applied_ref, atol=2e-3, rtol=2e-3), "applied mismatch"
    assert jnp.allclose(jnp.sum(weights, axis=-1), 1.0, atol=2e-3), "softmax not normalized"
    assert jnp.all(weights[1, 0, 5:] < 1e-6), "length mask not applied"

    print("KERNEL_OK")
</pallas_src>

<mosaic_0001>
module attributes {stable_mosaic.version = 11 : i64} {
  func.func @self_attention_kernel(%arg0: i32, %arg1: memref<2x8x32xf32, #tpu.memory_space<vmem>>, %arg2: memref<2x1x8xf32, #tpu.memory_space<vmem>>, %arg3: memref<32x128xbf16, #tpu.memory_space<vmem>>, %arg4: memref<1x128xf32, #tpu.memory_space<vmem>>, %arg5: memref<1x32xf32, #tpu.memory_space<vmem>>, %arg6: memref<2x1x32xf32, #tpu.memory_space<vmem>>, %arg7: memref<2x1x8xf32, #tpu.memory_space<vmem>>) attributes {dimension_semantics = [#tpu.dimension_semantics<parallel>], iteration_bounds = array<i64: 1>, scalar_prefetch = 0 : i64, scratch_operands = 0 : i64, tpu.core_type = #tpu.core_type<tc>, window_params = [{transform_indices = @transform_0, window_bounds = array<i64: 2, 8, 32>}, {transform_indices = @transform_1, window_bounds = array<i64: 2, 1, 8>}, {pipeline_mode = #tpu.pipeline_mode<synchronous>, transform_indices = @transform_2, window_bounds = array<i64: 32, 128>}, {pipeline_mode = #tpu.pipeline_mode<synchronous>, transform_indices = @transform_3, window_bounds = array<i64: 1, 128>}, {pipeline_mode = #tpu.pipeline_mode<synchronous>, transform_indices = @transform_4, window_bounds = array<i64: 1, 32>}, {transform_indices = @transform_5, window_bounds = array<i64: 2, 1, 32>}, {transform_indices = @transform_6, window_bounds = array<i64: 2, 1, 8>}]} {
    %c0 = arith.constant 0 : index
    %c0_0 = arith.constant 0 : index
    %c0_1 = arith.constant 0 : index
    %0 = vector.load %arg1[%c0, %c0_0, %c0_1] : memref<2x8x32xf32, #tpu.memory_space<vmem>>, vector<2x8x32xf32>
    %1 = vector.shape_cast %0 : vector<2x8x32xf32> to vector<16x32xf32>
    %2 = arith.truncf %1 : vector<16x32xf32> to vector<16x32xbf16>
    %c0_2 = arith.constant 0 : index
    %c0_3 = arith.constant 0 : index
    %3 = vector.load %arg3[%c0_2, %c0_3] : memref<32x128xbf16, #tpu.memory_space<vmem>>, vector<32x128xbf16>
    %cst = arith.constant dense<0.000000e+00> : vector<16x128xf32>
    %4 = tpu.matmul %2, %3, %cst {dimension_numbers = #tpu.dot_dimension_numbers<[1], [0], [0], [1], [0, 0, 1, 1], [], []>} : vector<16x32xbf16>, vector<32x128xbf16>, vector<16x128xf32> -> vector<16x128xf32>
    %c0_4 = arith.constant 0 : index
    %c0_5 = arith.constant 0 : index
    %5 = vector.load %arg4[%c0_4, %c0_5] : memref<1x128xf32, #tpu.memory_space<vmem>>, vector<1x128xf32>
    %6 = vector.broadcast %5 : vector<1x128xf32> to vector<16x128xf32>
    %7 = arith.addf %4, %6 : vector<16x128xf32>
    %8 = vector.extract_strided_slice %7 {offsets = [0, 0], sizes = [16, 32], strides = [1, 1]} : vector<16x128xf32> to vector<16x32xf32>
    %cst_6 = arith.constant 0.000000e+00 : f32
    %9 = vector.broadcast %cst_6 : f32 to vector<16x32xf32>
    %10 = arith.maximumf %8, %9 : vector<16x32xf32>
    %11 = vector.extract_strided_slice %7 {offsets = [0, 32], sizes = [16, 32], strides = [1, 1]} : vector<16x128xf32> to vector<16x32xf32>
    %12 = arith.negf %11 : vector<16x32xf32>
    %13 = math.exp %12 : vector<16x32xf32>
    %cst_7 = arith.constant 1.000000e+00 : f32
    %14 = vector.broadcast %cst_7 : f32 to vector<16x32xf32>
    %15 = arith.addf %14, %13 : vector<16x32xf32>
    %16 = arith.divf %14, %15 : vector<16x32xf32>
    %17 = vector.extract_strided_slice %7 {offsets = [0, 64], sizes = [16, 32], strides = [1, 1]} : vector<16x128xf32> to vector<16x32xf32>
    %cst_8 = arith.constant 0.000000e+00 : f32
    %18 = vector.broadcast %cst_8 : f32 to vector<16x32xf32>
    %19 = arith.maximumf %17, %18 : vector<16x32xf32>
    %20 = vector.extract_strided_slice %7 {offsets = [0, 96], sizes = [16, 32], strides = [1, 1]} : vector<16x128xf32> to vector<16x32xf32>
    %21 = arith.negf %20 : vector<16x32xf32>
    %22 = math.exp %21 : vector<16x32xf32>
    %cst_9 = arith.constant 1.000000e+00 : f32
    %23 = vector.broadcast %cst_9 : f32 to vector<16x32xf32>
    %24 = arith.addf %23, %22 : vector<16x32xf32>
    %25 = arith.divf %23, %24 : vector<16x32xf32>
    %26 = arith.subf %10, %1 : vector<16x32xf32>
    %27 = arith.mulf %16, %26 : vector<16x32xf32>
    %28 = arith.addf %1, %27 : vector<16x32xf32>
    %29 = vector.shape_cast %28 : vector<16x32xf32> to vector<2x8x32xf32>
    %30 = arith.subf %19, %1 : vector<16x32xf32>
    %31 = arith.mulf %25, %30 : vector<16x32xf32>
    %32 = arith.addf %1, %31 : vector<16x32xf32>
    %33 = vector.shape_cast %32 : vector<16x32xf32> to vector<2x8x32xf32>
    %c0_10 = arith.constant 0 : index
    %c0_11 = arith.constant 0 : index
    %34 = vector.load %arg5[%c0_10, %c0_11] : memref<1x32xf32, #tpu.memory_space<vmem>>, vector<1x32xf32>
    %35 = vector.shape_cast %34 : vector<1x32xf32> to vector<1x1x32xf32>
    %36 = vector.broadcast %35 : vector<1x1x32xf32> to vector<2x8x32xf32>
    %37 = arith.mulf %29, %36 : vector<2x8x32xf32>
    %cst_12 = arith.constant dense<0.000000e+00> : vector<2x8xf32>
    %38 = vector.multi_reduction <add>, %37, %cst_12 [2] : vector<2x8x32xf32> to vector<2x8xf32>
    %c0_13 = arith.constant 0 : index
    %c0_14 = arith.constant 0 : index
    %c0_15 = arith.constant 0 : index
    %39 = vector.load %arg2[%c0_13, %c0_14, %c0_15] : memref<2x1x8xf32, #tpu.memory_space<vmem>>, vector<2x1x8xf32>
    %40 = vector.shape_cast %39 : vector<2x1x8xf32> to vector<2x8xf32>
    %41 = arith.addf %38, %40 : vector<2x8xf32>
    %cst_16 = arith.constant dense<0xFF800000> : vector<2xf32>
    %42 = vector.multi_reduction <maximumf>, %41, %cst_16 [1] : vector<2x8xf32> to vector<2xf32>
    %43 = vector.shape_cast %42 : vector<2xf32> to vector<2x1xf32>
    %44 = vector.broadcast %43 : vector<2x1xf32> to vector<2x8xf32>
    %45 = arith.subf %41, %44 : vector<2x8xf32>
    %46 = math.exp %45 : vector<2x8xf32>
    %cst_17 = arith.constant dense<0.000000e+00> : vector<2xf32>
    %47 = vector.multi_reduction <add>, %46, %cst_17 [1] : vector<2x8xf32> to vector<2xf32>
    %48 = vector.shape_cast %47 : vector<2xf32> to vector<2x1xf32>
    %49 = tpu.reciprocal %48 {approx = true} : vector<2x1xf32> -> vector<2x1xf32>
    %50 = vector.broadcast %49 : vector<2x1xf32> to vector<2x8xf32>
    %51 = arith.mulf %46, %50 : vector<2x8xf32>
    %52 = vector.shape_cast %51 : vector<2x8xf32> to vector<2x1x8xf32>
    %c0_18 = arith.constant 0 : index
    %c0_19 = arith.constant 0 : index
    %c0_20 = arith.constant 0 : index
    %53 = vector.load %arg7[%c0_18, %c0_19, %c0_20] : memref<2x1x8xf32, #tpu.memory_space<vmem>>, vector<2x1x8xf32>
    tpu.vector_store %arg7[%c0_18, %c0_19, %c0_20], %52 {strides = array<i32>} : memref<2x1x8xf32, #tpu.memory_space<vmem>>, vector<2x1x8xf32>,
    "tpu.trace_start"() <{level = 10 : i32, message = "bql,bld->bqd"}> : () -> ()
    %cst_21 = arith.constant dense<0.000000e+00> : vector<2x1x32xf32>
    %54 = tpu.matmul %52, %33, %cst_21 {dimension_numbers = #tpu.dot_dimension_numbers<[2], [1], [1], [2], [0, 0, 0, 1, 1, 2], [0], [0]>} : vector<2x1x8xf32>, vector<2x8x32xf32>, vector<2x1x32xf32> -> vector<2x1x32xf32>
    "tpu.trace_stop"() : () -> ()
    %c0_22 = arith.constant 0 : index
    %c0_23 = arith.constant 0 : index
    %c0_24 = arith.constant 0 : index
    %55 = vector.load %arg6[%c0_22, %c0_23, %c0_24] : memref<2x1x32xf32, #tpu.memory_space<vmem>>, vector<2x1x32xf32>
    tpu.vector_store %arg6[%c0_22, %c0_23, %c0_24], %54 {strides = array<i32>} : memref<2x1x32xf32, #tpu.memory_space<vmem>>, vector<2x1x32xf32>,
    return
  }
  func.func @transform_0(%arg0: i32) -> (i32, i32, i32) {
    %c0_i32 = arith.constant 0 : i32
    %c0_i32_0 = arith.constant 0 : i32
    %c0_i32_1 = arith.constant 0 : i32
    return %arg0, %c0_i32, %c0_i32_0 : i32, i32, i32
  }
  func.func @transform_1(%arg0: i32) -> (i32, i32, i32) {
    %c0_i32 = arith.constant 0 : i32
    %c0_i32_0 = arith.constant 0 : i32
    %c0_i32_1 = arith.constant 0 : i32
    return %arg0, %c0_i32, %c0_i32_0 : i32, i32, i32
  }
  func.func @transform_2(%arg0: i32) -> (i32, i32) {
    %c0_i32 = arith.constant 0 : i32
    %c0_i32_0 = arith.constant 0 : i32
    %c0_i32_1 = arith.constant 0 : i32
    return %c0_i32, %c0_i32_0 : i32, i32
  }
  func.func @transform_3(%arg0: i32) -> (i32, i32) {
    %c0_i32 = arith.constant 0 : i32
    %c0_i32_0 = arith.constant 0 : i32
    %c0_i32_1 = arith.constant 0 : i32
    return %c0_i32, %c0_i32_0 : i32, i32
  }
  func.func @transform_4(%arg0: i32) -> (i32, i32) {
    %c0_i32 = arith.constant 0 : i32
    %c0_i32_0 = arith.constant 0 : i32
    %c0_i32_1 = arith.constant 0 : i32
    return %c0_i32, %c0_i32_0 : i32, i32
  }
  func.func @transform_5(%arg0: i32) -> (i32, i32, i32) {
    %c0_i32 = arith.constant 0 : i32
    %c0_i32_0 = arith.constant 0 : i32
    %c0_i32_1 = arith.constant 0 : i32
    return %arg0, %c0_i32, %c0_i32_0 : i32, i32, i32
  }
  func.func @transform_6(%arg0: i32) -> (i32, i32, i32) {
    %c0_i32 = arith.constant 0 : i32
    %c0_i32_0 = arith.constant 0 : i32
    %c0_i32_1 = arith.constant 0 : i32
    return %arg0, %c0_i32, %c0_i32_0 : i32, i32, i32
  }
}

</mosaic_0001>

<bundles_post_ra>
// kernel: self_attention.1
= control target key start
LH: loop header
LB: loop body
LE: loop exit
PB: predicated region body
PF: predicated region fallthrough
CT: control target
= control target key end

     0   :  { %12 = vsyncpa [#allocation3], 0  ;;  %s847_s0 = inlined_call_operand.hbm [shape: f32[2,8,32], index: 0, kind: input, shape index: {}]   ;;  %s848_s1 = inlined_call_operand.vmem [shape: f32[2,1,8], index: 1, kind: input, shape index: {}]   ;;  %s849_s2 = inlined_call_operand.hbm [shape: bf16[32,128], index: 2, kind: input, shape index: {}]   ;;  %s850_s3 = inlined_call_operand.vmem [shape: f32[1,128], index: 3, kind: input, shape index: {}]   ;;  %s851_s4 = inlined_call_operand.vmem [shape: f32[1,32], index: 4, kind: input, shape index: {}]   ;;  %s852_s5 = inlined_call_operand.hbm [shape: f32[2,1,32], index: 5, kind: output, shape index: {0}]   ;;  %s853_s6 = inlined_call_operand.hbm [shape: f32[2,1,8], index: 6, kind: output, shape index: {1}]  }
   0x1   :  { %13 = vsyncpa [#allocation6], 0 }
   0x2   :  { %14 = vsyncpa [#allocation4], 0 }
   0x3   :  { %15 = vsyncpa [#allocation9], 0  ;;  %s672_s21 = smov [#allocation2]   ;;  %s576_s25 = scalar_lea.hbm %s847_s0, 256 }
   0x4   :  { %s21_s22 = sshll.u32 %s672_s21, 4  ;;  %p577_p0 = scmp.ne.s32.totalorder %s847_s0, %s576_s25  ;;  %s22_s22 = int_to_ptr.vmem [resolvable:$true] %s21_s22 }
   0x5   :  { %p580_p1 = scmp.lt.u32.totalorder %s576_s25, %s847_s0 }
   0x7   :  { %p582_p2 = pnand %p580_p1, %p577_p0 }
   0x9   :  { %585 = shalt.err (!%p582_p2)
}
   0xa   :  { %s586_s30 = scalar_lea.vmem %s22_s22, 256  ;;  %p591_p4 = scmp.lt.s32.totalorder %s22_s22, %s22_s22 }
   0xb   :  { %p587_p3 = scmp.ne.s32.totalorder %s22_s22, %s586_s30  ;;  %p592_p5 = scmp.lt.s32.totalorder %s586_s30, %s586_s30 }
   0xd   :  { %p593_p6 = por %p592_p5, %p591_p4 }
   0xf   :  { %p594_p7 = pnand %p593_p6, %p587_p3 }
  0x11   :  { %597 = shalt.err (!%p594_p7)
}
  0x12   :  { %s673_s7 = smov 128   ;;  %s674_s8 = smov 8  }
  0x13   :  { %27 = dma.hbm_to_vmem [thread:$0]  %s847_s0, 256, %s22_s22, [#allocation3], %s673_s7, %s673_s7, %s674_s8  }
  0x14   :  { %s675_s11 = smov [#allocation5]   ;;  %s598_s15 = scalar_lea.hbm %s849_s2, 256 }
  0x15   :  { %s35_s12 = sshll.u32 %s675_s11, 4  ;;  %p599_p8 = scmp.ne.s32.totalorder %s849_s2, %s598_s15  ;;  %s36_s12 = int_to_ptr.vmem [resolvable:$true] %s35_s12 }
  0x16   :  { %p602_p9 = scmp.lt.u32.totalorder %s598_s15, %s849_s2 }
  0x18   :  { %p604_p10 = pnand %p602_p9, %p599_p8 }
  0x1a   :  { %607 = shalt.err (!%p604_p10)
}
  0x1b   :  { %s608_s20 = scalar_lea.vmem %s36_s12, 256  ;;  %p613_p12 = scmp.lt.s32.totalorder %s36_s12, %s36_s12 }
  0x1c   :  { %p609_p11 = scmp.ne.s32.totalorder %s36_s12, %s608_s20  ;;  %p614_p13 = scmp.lt.s32.totalorder %s608_s20, %s608_s20 }
  0x1e   :  { %p615_p0 = por %p614_p13, %p613_p12 }
  0x20   :  { %p616_p1 = pnand %p615_p0, %p609_p11 }
  0x22   :  { %619 = shalt.err (!%p616_p1)
}
  0x23   :  { %s676_s0 = smov 64   ;;  %s677_s21 = smov 4  }
  0x24   :  { %41 = dma.hbm_to_vmem [thread:$0]  %s849_s2, 256, %s36_s12, [#allocation6], %s676_s0, %s676_s0, %s677_s21  }
  0x25   :  { %664 = dma.done.wait [#allocation3], 256  }
  0x26   :  { %665 = vsyncadd [#allocation3], 4294967040 }
  0x27   :  { %666 = dma.done.wait [#allocation6], 256  }
  0x28   :  { %667 = vsyncadd [#allocation6], 4294967040  ;;  %v678_v0 = vmov 0.0   ;;  %vm679_vm0 = vmmov 0   ;;  %v560_v1 = vld [vmem:[#allocation5] sm:$0xff]   ;;  %v561_v2 = vld [vmem:[#allocation5 + $0x8] sm:$0xff]   ;;  %v235_v47 = vlaneseq }
  0x29   :  { %525 = vmatprep.subr.bf16.mxu0 %v678_v0  ;;  %529 = vmatprep.mubr.msk.bf16.mxu0 %vm679_vm0, %v678_v0  ;;  %v754_v3 = vld [vmem:[#allocation2] sm:$0xff]  ;;  %v756_v4 = vld [vmem:[#allocation2 + $0x8] sm:$0xff]  ;;  %vm79_vm1 = vcmask 261120   ;;  %s680_s25 = smov 32   ;;  %v682_v40 = vmov 0   ;;  %vm245_vm2 = vcmask 1041409  }
  0x2a   :  { %533 = vmatprep.subr.mxu1 %v678_v0  ;;  %535 = vmatprep.mubr.msk.f32.mxu1 %vm679_vm0, %v678_v0  ;;  %v55_v5 = vpack.c.bf16 %v756_v4, %v754_v3  ;;  %v507_v6 = vld [vmem:[%s850_s3] ss:$0 sm:$0xff]  ;;  %s681_s3 = smov 96   ;;  %v515_v38 = vld [vmem:[%s848_s1 + $0x1] ss:$0 sm:$0xff]  ;;  %v236_v48 = vand.u32 127, %v235_v47 }
  0x2b   :  { %526 = vmatpush3.bf16.msra.mxu0 %v560_v1  ;;  %v513_v30 = vld [vmem:[%s851_s4] ss:$0 sm:$0xff]  ;;  %558 = vset.pattern.permute.xlu0 %v682_v40  ;;  %v238_v49 = vshrl.u32 %v235_v47, 7  ;;  %vm248_vm3 = vcmask 58368   ;;  %vm322_vm4 = vcmask 57344   ;;  %vm325_vm5 = vcmask 64512  }
  0x2c   :  { %527 = vmatprep.subr.bf16.mxu0 %v678_v0  ;;  %v514_v39 = vld [vmem:[%s848_s1] ss:$0 sm:$0xff]  ;;  %559 = vset.pattern.permute.xlu1 %v682_v40  ;;  %s683_s1 = smov [#allocation8]  }
  0x2d   :  { %v239_v50 = vsub.s32 %v236_v48, %v238_v49  ;;  %v255_v57 = vsub.s32 0, %v238_v49  ;;  %v259_v58 = vsub.s32 1, %v238_v49  ;;  %s490_s4 = sshll.u32 %s683_s1, 4  ;;  %s491_s4 = int_to_ptr.vmem [resolvable:$true] %s490_s4 }
  0x2e   :  { %s620_s8 = scalar_lea.vmem %s491_s4, 32  ;;  %p625_p3 = scmp.lt.s32.totalorder %s491_s4, %s491_s4 }
  0x2f   :  { %528 = vmatpush3.bf16.msra.mxu0 %v561_v2  ;;  %p621_p2 = scmp.ne.s32.totalorder %s491_s4, %s620_s8  ;;  %p626_p4 = scmp.lt.s32.totalorder %s620_s8, %s620_s8 }
  0x31   :  { %p627_p5 = por %p626_p4, %p625_p3 }
  0x32   :  { %530 = vmatmul.mubr.msk.bf16.vlgmr.msra.gmra.mrb[0].mxu0 %vm79_vm1, %v55_v5 }
  0x33   :  { %p628_p6 = pnand %p627_p5, %p621_p2 }
 0x105   :  { %v117_v7 = vpop.f32.mrb[0].mxu0 }
 0x106   :  { %v765_v8 = vadd.f32 %v507_v6, %v117_v7  ;;  %v531_v9 = vpop.f32.mrb[1].mxu0 }
 0x107   :  { %v120_v10 = vpop.f32.mrb[2].mxu0 }
 0x108   :  { %v124_v11 = vmax.f32 %v765_v8, 0.0  ;;  %v768_v12 = vadd.f32 %v507_v6, %v120_v10  ;;  %v532_v13 = vpop.f32.mrb[3].mxu0  ;;  %v511_v17 = vmul.f32 -1.442695, %v765_v8 }
 0x10a   :  { %v125_v14 = vmax.f32 %v768_v12, 0.0  ;;  %v138_v15 = vsub.f32 %v124_v11, %v754_v3  ;;  %562 = vpow2.f32 %v511_v17  ;;  %v512_v18 = vmul.f32 -1.442695, %v768_v12 }
 0x10c   :  { %142 = vrot.lane.b32.xlu0 %v138_v15, %s680_s25  ;;  %v139_v16 = vsub.f32 %v125_v14, %v756_v4  ;;  %564 = vpow2.f32 %v512_v18 }
 0x110   :  { %144 = vrot.lane.b32.xlu0 %v139_v16, %s680_s25 }
 0x114   :  { %v563_v19 = vpop.eup %562 }
 0x115   :  { %v132_v20 = vadd.f32 1.0, %v563_v19 }
 0x116   :  { %v565_v21 = vpop.eup %564 }
 0x117   :  { %566 = vrcp.f32 %v132_v20  ;;  %v133_v22 = vadd.f32 1.0, %v565_v21 }
 0x119   :  { %568 = vrcp.f32 %v133_v22 }
 0x121   :  { %v781_v23 = vpop.eup %566 }
 0x123   :  { %v784_v26 = vpop.eup %568 }
 0x17e   :  { %v143_v24 = vpop.permute.xlu0 %142 }
 0x17f   :  { %v148_v25 = vmul.f32 %v781_v23, %v143_v24 }
 0x181   :  { %152 = vrot.lane.b32.xlu1 %v148_v25, %s681_s3 }
 0x182   :  { %v145_v27 = vpop.permute.xlu0 %144 }
 0x183   :  { %v149_v28 = vmul.f32 %v784_v26, %v145_v27 }
 0x185   :  { %154 = vrot.lane.b32.xlu1 %v149_v28, %s681_s3 }
 0x1f3   :  { %v153_v29 = vpop.permute.xlu1 %152 }
 0x1f4   :  { %v158_v31 = vadd.f32 %v153_v29, %v754_v3 }
 0x1f6   :  { %v197_v32 = vmul.f32 %v513_v30, %v158_v31 }
 0x1f7   :  { %v155_v33 = vpop.permute.xlu1 %154 }
 0x1f8   :  { %v159_v34 = vadd.f32 %v155_v33, %v756_v4  ;;  %v199_v35 = vsel %vm79_vm1, %v197_v32, 0.0 }
 0x1f9   :  { %200 = vadd.xlane.f32.xlu0 %v199_v35 }
 0x1fa   :  { %v198_v36 = vmul.f32 %v513_v30, %v159_v34 }
 0x1fc   :  { %v202_v37 = vsel %vm79_vm1, %v198_v36, 0.0 }
 0x1fd   :  { %203 = vadd.xlane.f32.xlu1 %v202_v37 }
 0x20e   :  { %221 = vbcast.lane.b32.xlu1 %v515_v38, 256 }
 0x20f   :  { %218 = vbcast.lane.b32.xlu0 %v514_v39, 256 }
 0x286   :  { %v201_v41 = vpop.xlane.xlu0 %200 }
 0x28a   :  { %v204_v42 = vpop.xlane.xlu1 %203  ;;  %v219_v43 = vpop.permute.xlu0 %218 }
 0x28b   :  { %v225_v44 = vadd.f32 %v219_v43, %v201_v41 }
 0x28d   :  { %230 = vperm.xlu0 %558, %v225_v44  }
 0x28e   :  { %v222_v45 = vpop.permute.xlu1 %221 }
 0x28f   :  { %v226_v46 = vadd.f32 %v222_v45, %v204_v42 }
 0x291   :  { %233 = vperm.xlu1 %559, %v226_v46  }
 0x30c   :  { %v231_v51 = vpop.permute.xlu0 %230 }
 0x30d   :  { %v240_v53 = vrot.slane %v231_v51, %v239_v50 }
 0x310   :  { %v234_v52 = vpop.permute.xlu1 %233 }
 0x311   :  { %v244_v54 = vrot.slane %v234_v52, %v239_v50 }
 0x313   :  { %v246_v55 = vsel %vm245_vm2, %v244_v54, %v240_v53 }
 0x314   :  { %v249_v56 = vsel %vm248_vm3, %v246_v55, -inf }
 0x315   :  { %250 = vmax.xlane.f32.xlu1 %v249_v56 }
 0x3a2   :  { %v251_v59 = vpop.xlane.xlu1 %250 }
 0x3a3   :  { %v256_v60 = vrot.slane %v251_v59, %v255_v57  ;;  %v260_v61 = vrot.slane %v251_v59, %v259_v58 }
 0x3a5   :  { %v263_v62 = vsub.f32 %v225_v44, %v256_v60  ;;  %v264_v63 = vsub.f32 %v226_v46, %v260_v61 }
 0x3a7   :  { %v265_v1 = vmul.f32 1.442695, %v263_v62  ;;  %v267_v2 = vmul.f32 1.442695, %v264_v63 }
 0x3a9   :  { %570 = vpow2.f32 %v265_v1 }
 0x3aa   :  { %572 = vpow2.f32 %v267_v2 }
 0x3b3   :  { %v571_v5 = vpop.eup %570 }
 0x3b4   :  { %272 = vperm.xlu0 %558, %v571_v5   ;;  %v573_v6 = vpop.eup %572 }
 0x3b8   :  { %275 = vperm.xlu0 %558, %v573_v6  }
 0x3bc   :  { %162 = vrot.lane.b32.xlu0 %v754_v3, %s676_s0 }
 0x3c0   :  { %164 = vrot.lane.b32.xlu0 %v756_v4, %s676_s0 }
 0x433   :  { %v273_v7 = vpop.permute.xlu0 %272 }
 0x434   :  { %v280_v10 = vrot.slane %v273_v7, %v239_v50 }
 0x437   :  { %v276_v9 = vpop.permute.xlu0 %275 }
 0x438   :  { %v284_v13 = vrot.slane %v276_v9, %v239_v50 }
 0x43a   :  { %v285_v15 = vsel %vm245_vm2, %v284_v13, %v280_v10 }
 0x43b   :  { %v163_v16 = vpop.permute.xlu0 %162  ;;  %v287_v17 = vsel %vm248_vm3, %v285_v15, 0.0 }
 0x43c   :  { %v168_v18 = vsub.f32 %v124_v11, %v163_v16  ;;  %288 = vadd.xlane.f32.xlu0 %v287_v17 }
 0x43e   :  { %172 = vrot.lane.b32.xlu1 %v168_v18, %s680_s25 }
 0x43f   :  { %v165_v19 = vpop.permute.xlu0 %164 }
 0x440   :  { %v169_v20 = vsub.f32 %v125_v14, %v165_v19 }
 0x452   :  { %174 = vrot.lane.b32.xlu0 %v169_v20, %s680_s25 }
 0x4b0   :  { %v173_v29 = vpop.permute.xlu1 %172 }
 0x4b1   :  { %v178_v8 = vmul.f32 %v781_v23, %v173_v29 }
 0x4c9   :  { %v289_v21 = vpop.xlane.xlu0 %288 }
 0x4ca   :  { %574 = vrcp.f32 %v289_v21 }
 0x4cd   :  { %v175_v11 = vpop.permute.xlu0 %174 }
 0x4ce   :  { %v179_v12 = vmul.f32 %v784_v26, %v175_v11 }
 0x4d4   :  { %v575_v22 = vpop.eup %574 }
 0x4d5   :  { %v295_v24 = vrot.slane %v575_v22, %v255_v57  ;;  %v299_v27 = vrot.slane %v575_v22, %v259_v58 }
 0x4d7   :  { %v302_v25 = vmul.f32 %v571_v5, %v295_v24  ;;  %v303_v28 = vmul.f32 %v573_v6, %v299_v27 }
 0x4d9   :  { %307 = vperm.xlu1 %559, %v302_v25  }
 0x4dd   :  { %310 = vperm.xlu1 %559, %v303_v28  }
 0x4e1   :  { %182 = vrot.lane.b32.xlu1 %v178_v8, %s680_s25 }
 0x4e5   :  { %184 = vrot.lane.b32.xlu1 %v179_v12, %s680_s25 }
 0x558   :  { %v308_v14 = vpop.permute.xlu1 %307 }
 0x559   :  { %v315_v30 = vrot.slane %v308_v14, %v239_v50 }
 0x55b   :  { %323 = vst.msk [vmem:[#allocation8] sm:$0x1] %vm322_vm4, %v315_v30 }
 0x55c   :  { %v311_v31 = vpop.permute.xlu1 %310 }
 0x55d   :  { %v319_v32 = vrot.slane %v311_v31, %v239_v50 }
 0x55f   :  { %324 = vst.msk [vmem:[#allocation8 + $0x1] sm:$0x1] %vm322_vm4, %v319_v32 }
 0x560   :  { %v183_v33 = vpop.permute.xlu1 %182 }
 0x561   :  { %v188_v34 = vadd.f32 %v183_v33, %v754_v3 }
 0x563   :  { %534 = vmatpush3.msra.mxu1 %v188_v34 }
 0x564   :  { %536 = vmatmul.mubr.msk.f32.vlgmr.msra.gmra.mrb[0].mxu1 %vm325_vm5, %v315_v30  ;;  %v185_v23 = vpop.permute.xlu1 %184  ;;  %538 = vmatprep.subr.mxu1 %v678_v0 }
 0x565   :  { %v189_v26 = vadd.f32 %v185_v23, %v756_v4  ;;  %540 = vmatprep.mubr.msk.f32.mxu1 %vm679_vm0, %v678_v0 }
 0x567   :  { %539 = vmatpush3.msra.mxu1 %v189_v26 }
 0x568   :  { %541 = vmatmul.mubr.msk.f32.vlgmr.msra.gmra.mrb[2].mxu1 %vm325_vm5, %v319_v32 }
 0x569   :  { %631 = shalt.err (!%p628_p6)
}
 0x56a   :  { %s632_s11 = scalar_lea.hbm %s853_s6, 32 }
 0x56b   :  { %p633_p7 = scmp.ne.s32.totalorder %s853_s6, %s632_s11  ;;  %p636_p8 = scmp.lt.u32.totalorder %s632_s11, %s853_s6 }
 0x56d   :  { %p638_p9 = pnand %p636_p8, %p633_p7 }
 0x56f   :  { %641 = shalt.err (!%p638_p9)
}
 0x570   :  { %s684_s16 = smov 16   ;;  %s685_s17 = smov 1   ;;  %vm470_vm6 = vcmask 253952  }
 0x571   :  { %496 = dma.vmem_to_hbm [thread:$0]  %s491_s4, 32, %s853_s6, [#allocation9], %s684_s16, %s684_s16, %s685_s17  }
 0x572   :  { %s686_s20 = smov [#allocation7]  }
 0x573   :  { %s478_s0 = sshll.u32 %s686_s20, 4  ;;  %s479_s0 = int_to_ptr.vmem [resolvable:$true] %s478_s0 }
 0x574   :  { %s642_s21 = scalar_lea.vmem %s479_s0, 32  ;;  %p647_p11 = scmp.lt.s32.totalorder %s479_s0, %s479_s0 }
 0x575   :  { %p643_p10 = scmp.ne.s32.totalorder %s479_s0, %s642_s21  ;;  %p648_p12 = scmp.lt.s32.totalorder %s642_s21, %s642_s21 }
 0x577   :  { %p649_p13 = por %p648_p12, %p647_p11 }
 0x579   :  { %p650_p0 = pnand %p649_p13, %p643_p10 }
 0x637   :  { %v394_v0 = vpop.f32.mrb[0].mxu1 }
 0x638   :  { %471 = vst.msk [vmem:[#allocation7] sm:$0x1] %vm470_vm6, %v394_v0  ;;  %v537_v3 = vpop.f32.mrb[1].mxu1 }
 0x63b   :  { %v466_v4 = vpop.f32.mrb[2].mxu1 }
 0x63c   :  { %472 = vst.msk [vmem:[#allocation7 + $0x1] sm:$0x1] %vm470_vm6, %v466_v4  ;;  %v542_v35 = vpop.f32.mrb[3].mxu1 }
 0x63d   :  { %653 = shalt.err (!%p650_p0)
}
 0x63e   :  { %s654_s6 = scalar_lea.hbm %s852_s5, 32 }
 0x63f   :  { %p655_p1 = scmp.ne.s32.totalorder %s852_s5, %s654_s6  ;;  %p658_p2 = scmp.lt.u32.totalorder %s654_s6, %s852_s5 }
 0x641   :  { %p660_p3 = pnand %p658_p2, %p655_p1 }
 0x643   :  { %663 = shalt.err (!%p660_p3)
}
 0x644   :  { %484 = dma.vmem_to_hbm [thread:$0]  %s479_s0, 32, %s852_s5, [#allocation4], %s684_s16, %s684_s16, %s685_s17  }
 0x645   :  { %668 = dma.done.wait [#allocation4], 32  }
 0x646   :  { %669 = vsyncadd [#allocation4], 4294967264 }
 0x647   :  { %670 = dma.done.wait [#allocation9], 32  }
 0x648   :  { %671 = vsyncadd [#allocation9], 4294967264 }
 0x649   :  { %503 = vsyncpa [#allocation3], 1 }
 0x64a   :  { %504 = vsyncpa [#allocation6], 1 }
 0x64b   :  { %505 = vsyncpa [#allocation4], 1 }
 0x64c   :  { %506 = vsyncpa [#allocation9], 1 }

</bundles_post_ra>
